<compile_context>
chip_gen: v7x
topology: tpu7x:2x2x1
jax: 0.10.0
libtpu: 0.0.40
codegen_flags: <defaults>
</compile_context>

<pallas_src>
import functools

import jax
import jax.numpy as jnp
from jax.experimental import pallas as pl
from jax.experimental.pallas import tpu as pltpu

# ---------------------------------------------------------------------------
# "args" from the original script, fixed deterministically here.
# ---------------------------------------------------------------------------
DIM_HIDDEN_LAYER = -1          # < 0  -> hidden dim == input_dim
DIM_LATENT_LAYER = -1          # == -1 -> noise dim == input_dim
EXTRA_HIDDEN_LAYER_GENERATOR = True
TAU = 0.2

CONTINUOUS_COLUMNS = ["c0", "c1", "c2", "c3"]          # 4 continuous columns
DISCRETE_COLUMNS = {"cat_a": 3, "cat_b": 5}            # categorical cardinalities

LANE = 128


def _round_up(x, m):
    return (x + m - 1) // m * m


# ---------------------------------------------------------------------------
# Kernel
# ---------------------------------------------------------------------------
def generator_kernel(*refs, num_cont, cat_sizes, tau, extra_hidden):
    if extra_hidden:
        (x_ref, w1_ref, b1_ref, w2_ref, b2_ref,
         wh_ref, bh_ref, g_ref, out_ref) = refs
    else:
        x_ref, w1_ref, b1_ref, wh_ref, bh_ref, g_ref, out_ref = refs

    # lin1 + relu (bf16 MXU inputs, f32 accumulate / bias / activation)
    h = jnp.dot(x_ref[...], w1_ref[...],
                preferred_element_type=jnp.float32) + b1_ref[...]
    h = jnp.maximum(h, 0.0)

    # optional lin2 + relu
    if extra_hidden:
        h = jnp.dot(h.astype(w2_ref.dtype), w2_ref[...],
                    preferred_element_type=jnp.float32) + b2_ref[...]
        h = jnp.maximum(h, 0.0)

    # fused heads: numerical + all categorical logits in a single matmul
    head = jnp.dot(h.astype(wh_ref.dtype), wh_ref[...],
                   preferred_element_type=jnp.float32) + bh_ref[...]

    tb, out_pad = head.shape
    col = jax.lax.broadcasted_iota(jnp.int32, (tb, out_pad), 1)
    num_mask = col < num_cont

    # numerical head: relu(head) on the first num_cont lanes
    x_num = jnp.maximum(head, 0.0)

    # masked segment gumbel-softmax over the categorical region
    noisy = (head + g_ref[...]) * (1.0 / tau)

    m_map = jnp.zeros_like(noisy)
    group_masks = []
    off = num_cont
    for v in cat_sizes:
        mask = jnp.logical_and(col >= off, col < off + v)
        m_g = jnp.max(jnp.where(mask, noisy, -jnp.inf), axis=-1, keepdims=True)
        m_map = m_map + jnp.where(mask, m_g, 0.0)
        group_masks.append(mask)
        off += v
    cat_mask = jnp.logical_and(col >= num_cont, col < off)

    # one exp over the full tile (non-categorical lanes forced to exp(-inf)=0)
    e = jnp.exp(jnp.where(cat_mask, noisy - m_map, -jnp.inf))

    inv_map = jnp.zeros_like(noisy)
    for mask in group_masks:
        den = jnp.sum(jnp.where(mask, e, 0.0), axis=-1, keepdims=True)
        r = pl.reciprocal(den, approx=True)          # EUP slot
        r = r * (2.0 - den * r)                      # 1 Newton step -> f32 accuracy
        inv_map = inv_map + jnp.where(mask, r, 0.0)
    p = e * inv_map

    # single lane-dense store of the full padded output block
    out_ref[...] = jnp.where(num_mask, x_num, p)


# ---------------------------------------------------------------------------
# Parameters (PyTorch nn.Linear-style init, then fused + lane-padded)
# ---------------------------------------------------------------------------
def make_generator_params(key, input_dim):
    hidden = input_dim if DIM_HIDDEN_LAYER < 0 else DIM_HIDDEN_LAYER
    noise = input_dim if DIM_LATENT_LAYER == -1 else DIM_LATENT_LAYER
    num_cont = len(CONTINUOUS_COLUMNS)
    cat_sizes = tuple(DISCRETE_COLUMNS.values())
    total_cat = sum(cat_sizes)
    out_dim = num_cont + total_cat

    hid_pad = _round_up(hidden, LANE)
    out_pad = _round_up(out_dim, LANE)

    keys = jax.random.split(key, 8)

    def lin(kw, kb, fan_in, fan_out):
        # nn.Linear default init: U(-1/sqrt(fan_in), 1/sqrt(fan_in))
        bound = 1.0 / (fan_in ** 0.5)
        w = jax.random.uniform(kw, (fan_in, fan_out), jnp.float32, -bound, bound)
        b = jax.random.uniform(kb, (1, fan_out), jnp.float32, -bound, bound)
        return w, b

    w1, b1 = lin(keys[0], keys[1], noise, hidden)
    w2, b2 = lin(keys[2], keys[3], hidden, hidden)       # lin2 (if extra layer)
    wn, bn = lin(keys[4], keys[5], hidden, num_cont)
    wc, bc = lin(keys[6], keys[7], hidden, total_cat)    # all lin_cat heads

    # fuse the numerical head and all categorical heads into one matmul
    wh = jnp.concatenate([wn, wc], axis=1)               # (hidden, out_dim)
    bh = jnp.concatenate([bn, bc], axis=1)               # (1, out_dim)

    def pad2(a, rows, cols):
        return jnp.pad(a, ((0, rows - a.shape[0]), (0, cols - a.shape[1])))

    return dict(
        # bf16 MXU operands, zero-padded to lane-dense shapes (exact: padded
        # lanes/rows are zero so they contribute nothing)
        w1=pad2(w1, noise, hid_pad).astype(jnp.bfloat16),
        w2=pad2(w2, hid_pad, hid_pad).astype(jnp.bfloat16),
        wh=pad2(wh, hid_pad, out_pad).astype(jnp.bfloat16),
        # biases stay f32
        b1=pad2(b1, 1, hid_pad),
        b2=pad2(b2, 1, hid_pad),
        bh=pad2(bh, 1, out_pad),
        hidden=hidden, noise=noise, hid_pad=hid_pad, out_pad=out_pad,
        num_cont=num_cont, cat_sizes=cat_sizes,
        total_cat=total_cat, out_dim=out_dim,
    )


# ---------------------------------------------------------------------------
# Forward wrapper
# ---------------------------------------------------------------------------
def generator_forward(params, x, gumbel, *, batch_tile=256):
    """x: (batch, noise) f32;  gumbel: (batch, out_pad) f32 Gumbel(0,1) noise."""
    batch = x.shape[0]
    noise = params["noise"]
    hid_pad = params["hid_pad"]
    out_pad = params["out_pad"]
    out_dim = params["out_dim"]

    # batch tile: multiple of 8 sublanes; pad the batch to a whole number of tiles
    tb = _round_up(min(batch_tile, _round_up(batch, 8)), 8)
    b_pad = _round_up(batch, tb)
    if b_pad != batch:
        x = jnp.pad(x, ((0, b_pad - batch), (0, 0)))
        gumbel = jnp.pad(gumbel, ((0, b_pad - batch), (0, 0)))
    x = x.astype(jnp.bfloat16)

    kernel = functools.partial(
        generator_kernel,
        num_cont=params["num_cont"],
        cat_sizes=params["cat_sizes"],
        tau=TAU,
        extra_hidden=EXTRA_HIDDEN_LAYER_GENERATOR,
    )

    def tiled(shape):        # batch-tiled operands
        return pl.BlockSpec(shape, lambda i: (i, 0))

    def resident(shape):     # weights/biases: same block every step -> stay in VMEM
        return pl.BlockSpec(shape, lambda i: (0, 0))

    in_specs = [tiled((tb, noise)),
                resident((noise, hid_pad)), resident((1, hid_pad))]
    args = [x, params["w1"], params["b1"]]
    if EXTRA_HIDDEN_LAYER_GENERATOR:
        in_specs += [resident((hid_pad, hid_pad)), resident((1, hid_pad))]
        args += [params["w2"], params["b2"]]
    in_specs += [resident((hid_pad, out_pad)), resident((1, out_pad)),
                 tiled((tb, out_pad))]
    args += [params["wh"], params["bh"], gumbel]

    out = pl.pallas_call(
        kernel,
        out_shape=jax.ShapeDtypeStruct((b_pad, out_pad), jnp.float32),
        grid=(b_pad // tb,),
        in_specs=in_specs,
        out_specs=tiled((tb, out_pad)),
        compiler_params=pltpu.CompilerParams(
            dimension_semantics=("parallel",)),
    )(*args)

    return out[:batch, :out_dim]


# ---------------------------------------------------------------------------
# Pure-JAX reference (same bf16-input / f32-accumulate math)
# ---------------------------------------------------------------------------
def generator_reference(params, x, gumbel):
    xb = x.astype(jnp.bfloat16)
    h = jnp.maximum(jnp.dot(xb, params["w1"],
                            preferred_element_type=jnp.float32) + params["b1"], 0.0)
    if EXTRA_HIDDEN_LAYER_GENERATOR:
        h = jnp.maximum(jnp.dot(h.astype(jnp.bfloat16), params["w2"],
                                preferred_element_type=jnp.float32) + params["b2"], 0.0)
    head = jnp.dot(h.astype(jnp.bfloat16), params["wh"],
                   preferred_element_type=jnp.float32) + params["bh"]
    num_cont = params["num_cont"]
    pieces = [jnp.maximum(head[:, :num_cont], 0.0)]
    off = num_cont
    for v in params["cat_sizes"]:
        z = (head[:, off:off + v] + gumbel[:, off:off + v]) / TAU
        pieces.append(jax.nn.softmax(z, axis=-1))
        off += v
    return jnp.concatenate(pieces, axis=1)


if __name__ == "__main__":
    input_dim = 32          # data dimension; noise dim == hidden dim == 32 here
    batch = 50              # deliberately not a multiple of the batch tile

    root = jax.random.PRNGKey(0)
    k_param, k_x, k_gumbel = jax.random.split(root, 3)

    params = make_generator_params(k_param, input_dim)
    x = jax.random.normal(k_x, (batch, params["noise"]), jnp.float32)
    # Gumbel(0,1) noise, same distribution torch.nn.functional.gumbel_softmax uses.
    gumbel = jax.random.gumbel(k_gumbel, (batch, params["out_pad"]), jnp.float32)

    out = generator_forward(params, x, gumbel, batch_tile=16)   # 4 grid steps
    out = jax.block_until_ready(out)

    out_dim = params["out_dim"]
    assert out.shape == (batch, out_dim), out.shape

    # each gumbel-softmax group sums to 1
    off = params["num_cont"]
    for v in params["cat_sizes"]:
        s = jnp.sum(out[:, off:off + v], axis=-1)
        assert jnp.allclose(s, 1.0, atol=1e-4), s
        off += v

    # matches the pure-JAX reference of the same forward pass
    ref = generator_reference(params, x, gumbel)
    assert jnp.allclose(out, ref, atol=2e-3, rtol=2e-3), (
        float(jnp.max(jnp.abs(out - ref))))

    print("KERNEL_OK")
</pallas_src>

<mosaic_0001>
module attributes {stable_mosaic.version = 11 : i64} {
  func.func @generator_kernel(%arg0: i32, %arg1: memref<16x32xbf16, #tpu.memory_space<vmem>>, %arg2: memref<32x128xbf16, #tpu.memory_space<vmem>>, %arg3: memref<1x128xf32, #tpu.memory_space<vmem>>, %arg4: memref<128x128xbf16, #tpu.memory_space<vmem>>, %arg5: memref<1x128xf32, #tpu.memory_space<vmem>>, %arg6: memref<128x128xbf16, #tpu.memory_space<vmem>>, %arg7: memref<1x128xf32, #tpu.memory_space<vmem>>, %arg8: memref<16x128xf32, #tpu.memory_space<vmem>>, %arg9: memref<16x128xf32, #tpu.memory_space<vmem>>) attributes {dimension_semantics = [#tpu.dimension_semantics<parallel>], iteration_bounds = array<i64: 4>, scalar_prefetch = 0 : i64, scratch_operands = 0 : i64, tpu.core_type = #tpu.core_type<tc>, window_params = [{transform_indices = @transform_0, window_bounds = array<i64: 16, 32>}, {pipeline_mode = #tpu.pipeline_mode<synchronous>, transform_indices = @transform_1, window_bounds = array<i64: 32, 128>}, {pipeline_mode = #tpu.pipeline_mode<synchronous>, transform_indices = @transform_2, window_bounds = array<i64: 1, 128>}, {pipeline_mode = #tpu.pipeline_mode<synchronous>, transform_indices = @transform_3, window_bounds = array<i64: 128, 128>}, {pipeline_mode = #tpu.pipeline_mode<synchronous>, transform_indices = @transform_4, window_bounds = array<i64: 1, 128>}, {pipeline_mode = #tpu.pipeline_mode<synchronous>, transform_indices = @transform_5, window_bounds = array<i64: 128, 128>}, {pipeline_mode = #tpu.pipeline_mode<synchronous>, transform_indices = @transform_6, window_bounds = array<i64: 1, 128>}, {transform_indices = @transform_7, window_bounds = array<i64: 16, 128>}, {transform_indices = @transform_8, window_bounds = array<i64: 16, 128>}]} {
    %c0 = arith.constant 0 : index
    %c0_0 = arith.constant 0 : index
    %0 = vector.load %arg1[%c0, %c0_0] : memref<16x32xbf16, #tpu.memory_space<vmem>>, vector<16x32xbf16>
    %c0_1 = arith.constant 0 : index
    %c0_2 = arith.constant 0 : index
    %1 = vector.load %arg2[%c0_1, %c0_2] : memref<32x128xbf16, #tpu.memory_space<vmem>>, vector<32x128xbf16>
    %cst = arith.constant dense<0.000000e+00> : vector<16x128xf32>
    %2 = tpu.matmul %0, %1, %cst {dimension_numbers = #tpu.dot_dimension_numbers<[1], [0], [0], [1], [0, 0, 1, 1], [], []>} : vector<16x32xbf16>, vector<32x128xbf16>, vector<16x128xf32> -> vector<16x128xf32>
    %c0_3 = arith.constant 0 : index
    %c0_4 = arith.constant 0 : index
    %3 = vector.load %arg3[%c0_3, %c0_4] : memref<1x128xf32, #tpu.memory_space<vmem>>, vector<1x128xf32>
    %4 = vector.broadcast %3 : vector<1x128xf32> to vector<16x128xf32>
    %5 = arith.addf %2, %4 : vector<16x128xf32>
    %cst_5 = arith.constant 0.000000e+00 : f32
    %6 = vector.broadcast %cst_5 : f32 to vector<16x128xf32>
    %7 = arith.maximumf %5, %6 : vector<16x128xf32>
    %8 = arith.truncf %7 : vector<16x128xf32> to vector<16x128xbf16>
    %c0_6 = arith.constant 0 : index
    %c0_7 = arith.constant 0 : index
    %9 = vector.load %arg4[%c0_6, %c0_7] : memref<128x128xbf16, #tpu.memory_space<vmem>>, vector<128x128xbf16>
    %cst_8 = arith.constant dense<0.000000e+00> : vector<16x128xf32>
    %10 = tpu.matmul %8, %9, %cst_8 {dimension_numbers = #tpu.dot_dimension_numbers<[1], [0], [0], [1], [0, 0, 1, 1], [], []>} : vector<16x128xbf16>, vector<128x128xbf16>, vector<16x128xf32> -> vector<16x128xf32>
    %c0_9 = arith.constant 0 : index
    %c0_10 = arith.constant 0 : index
    %11 = vector.load %arg5[%c0_9, %c0_10] : memref<1x128xf32, #tpu.memory_space<vmem>>, vector<1x128xf32>
    %12 = vector.broadcast %11 : vector<1x128xf32> to vector<16x128xf32>
    %13 = arith.addf %10, %12 : vector<16x128xf32>
    %cst_11 = arith.constant 0.000000e+00 : f32
    %14 = vector.broadcast %cst_11 : f32 to vector<16x128xf32>
    %15 = arith.maximumf %13, %14 : vector<16x128xf32>
    %16 = arith.truncf %15 : vector<16x128xf32> to vector<16x128xbf16>
    %c0_12 = arith.constant 0 : index
    %c0_13 = arith.constant 0 : index
    %17 = vector.load %arg6[%c0_12, %c0_13] : memref<128x128xbf16, #tpu.memory_space<vmem>>, vector<128x128xbf16>
    %cst_14 = arith.constant dense<0.000000e+00> : vector<16x128xf32>
    %18 = tpu.matmul %16, %17, %cst_14 {dimension_numbers = #tpu.dot_dimension_numbers<[1], [0], [0], [1], [0, 0, 1, 1], [], []>} : vector<16x128xbf16>, vector<128x128xbf16>, vector<16x128xf32> -> vector<16x128xf32>
    %c0_15 = arith.constant 0 : index
    %c0_16 = arith.constant 0 : index
    %19 = vector.load %arg7[%c0_15, %c0_16] : memref<1x128xf32, #tpu.memory_space<vmem>>, vector<1x128xf32>
    %20 = vector.broadcast %19 : vector<1x128xf32> to vector<16x128xf32>
    %21 = arith.addf %18, %20 : vector<16x128xf32>
    %22 = tpu.iota {dimensions = array<i32: 1>} : vector<16x128xi32>
    %c4_i32 = arith.constant 4 : i32
    %23 = vector.broadcast %c4_i32 : i32 to vector<16x128xi32>
    %24 = arith.cmpi slt, %22, %23 : vector<16x128xi32>
    %cst_17 = arith.constant 0.000000e+00 : f32
    %25 = vector.broadcast %cst_17 : f32 to vector<16x128xf32>
    %26 = arith.maximumf %21, %25 : vector<16x128xf32>
    %c0_18 = arith.constant 0 : index
    %c0_19 = arith.constant 0 : index
    %27 = vector.load %arg8[%c0_18, %c0_19] : memref<16x128xf32, #tpu.memory_space<vmem>>, vector<16x128xf32>
    %28 = arith.addf %21, %27 : vector<16x128xf32>
    %cst_20 = arith.constant 5.000000e+00 : f32
    %29 = vector.broadcast %cst_20 : f32 to vector<16x128xf32>
    %30 = arith.mulf %28, %29 : vector<16x128xf32>
    %cst_21 = arith.constant 0.000000e+00 : f32
    %31 = vector.broadcast %cst_21 : f32 to vector<16x128xf32>
    %c4_i32_22 = arith.constant 4 : i32
    %32 = vector.broadcast %c4_i32_22 : i32 to vector<16x128xi32>
    %33 = arith.cmpi sge, %22, %32 : vector<16x128xi32>
    %c7_i32 = arith.constant 7 : i32
    %34 = vector.broadcast %c7_i32 : i32 to vector<16x128xi32>
    %35 = arith.cmpi slt, %22, %34 : vector<16x128xi32>
    %36 = arith.andi %33, %35 : vector<16x128xi1>
    %cst_23 = arith.constant 0xFF800000 : f32
    %37 = vector.broadcast %cst_23 : f32 to vector<16x128xf32>
    %38 = arith.select %36, %30, %37 : vector<16x128xi1>, vector<16x128xf32>
    %cst_24 = arith.constant dense<0xFF800000> : vector<16xf32>
    %39 = vector.multi_reduction <maximumf>, %38, %cst_24 [1] : vector<16x128xf32> to vector<16xf32>
    %40 = vector.shape_cast %39 : vector<16xf32> to vector<16x1xf32>
    %cst_25 = arith.constant 0.000000e+00 : f32
    %41 = vector.shape_cast %40 : vector<16x1xf32> to vector<16x1xf32>
    %42 = vector.broadcast %41 : vector<16x1xf32> to vector<16x128xf32>
    %43 = vector.broadcast %cst_25 : f32 to vector<16x128xf32>
    %44 = arith.select %36, %42, %43 : vector<16x128xi1>, vector<16x128xf32>
    %45 = arith.addf %31, %44 : vector<16x128xf32>
    %c7_i32_26 = arith.constant 7 : i32
    %46 = vector.broadcast %c7_i32_26 : i32 to vector<16x128xi32>
    %47 = arith.cmpi sge, %22, %46 : vector<16x128xi32>
    %c12_i32 = arith.constant 12 : i32
    %48 = vector.broadcast %c12_i32 : i32 to vector<16x128xi32>
    %49 = arith.cmpi slt, %22, %48 : vector<16x128xi32>
    %50 = arith.andi %47, %49 : vector<16x128xi1>
    %cst_27 = arith.constant 0xFF800000 : f32
    %51 = vector.broadcast %cst_27 : f32 to vector<16x128xf32>
    %52 = arith.select %50, %30, %51 : vector<16x128xi1>, vector<16x128xf32>
    %cst_28 = arith.constant dense<0xFF800000> : vector<16xf32>
    %53 = vector.multi_reduction <maximumf>, %52, %cst_28 [1] : vector<16x128xf32> to vector<16xf32>
    %54 = vector.shape_cast %53 : vector<16xf32> to vector<16x1xf32>
    %cst_29 = arith.constant 0.000000e+00 : f32
    %55 = vector.shape_cast %54 : vector<16x1xf32> to vector<16x1xf32>
    %56 = vector.broadcast %55 : vector<16x1xf32> to vector<16x128xf32>
    %57 = vector.broadcast %cst_29 : f32 to vector<16x128xf32>
    %58 = arith.select %50, %56, %57 : vector<16x128xi1>, vector<16x128xf32>
    %59 = arith.addf %45, %58 : vector<16x128xf32>
    %c4_i32_30 = arith.constant 4 : i32
    %60 = vector.broadcast %c4_i32_30 : i32 to vector<16x128xi32>
    %61 = arith.cmpi sge, %22, %60 : vector<16x128xi32>
    %c12_i32_31 = arith.constant 12 : i32
    %62 = vector.broadcast %c12_i32_31 : i32 to vector<16x128xi32>
    %63 = arith.cmpi slt, %22, %62 : vector<16x128xi32>
    %64 = arith.andi %61, %63 : vector<16x128xi1>
    %65 = arith.subf %30, %59 : vector<16x128xf32>
    %cst_32 = arith.constant 0xFF800000 : f32
    %66 = vector.broadcast %cst_32 : f32 to vector<16x128xf32>
    %67 = arith.select %64, %65, %66 : vector<16x128xi1>, vector<16x128xf32>
    %68 = math.exp %67 : vector<16x128xf32>
    %cst_33 = arith.constant 0.000000e+00 : f32
    %69 = vector.broadcast %cst_33 : f32 to vector<16x128xf32>
    %cst_34 = arith.constant 0.000000e+00 : f32
    %70 = vector.broadcast %cst_34 : f32 to vector<16x128xf32>
    %71 = arith.select %36, %68, %70 : vector<16x128xi1>, vector<16x128xf32>
    %cst_35 = arith.constant dense<0.000000e+00> : vector<16xf32>
    %72 = vector.multi_reduction <add>, %71, %cst_35 [1] : vector<16x128xf32> to vector<16xf32>
    %73 = vector.shape_cast %72 : vector<16xf32> to vector<16x1xf32>
    %74 = tpu.reciprocal %73 {approx = true} : vector<16x1xf32> -> vector<16x1xf32>
    %75 = arith.mulf %73, %74 : vector<16x1xf32>
    %cst_36 = arith.constant 2.000000e+00 : f32
    %76 = vector.broadcast %cst_36 : f32 to vector<16x1xf32>
    %77 = arith.subf %76, %75 : vector<16x1xf32>
    %78 = arith.mulf %74, %77 : vector<16x1xf32>
    %cst_37 = arith.constant 0.000000e+00 : f32
    %79 = vector.shape_cast %78 : vector<16x1xf32> to vector<16x1xf32>
    %80 = vector.broadcast %79 : vector<16x1xf32> to vector<16x128xf32>
    %81 = vector.broadcast %cst_37 : f32 to vector<16x128xf32>
    %82 = arith.select %36, %80, %81 : vector<16x128xi1>, vector<16x128xf32>
    %83 = arith.addf %69, %82 : vector<16x128xf32>
    %cst_38 = arith.constant 0.000000e+00 : f32
    %84 = vector.broadcast %cst_38 : f32 to vector<16x128xf32>
    %85 = arith.select %50, %68, %84 : vector<16x128xi1>, vector<16x128xf32>
    %cst_39 = arith.constant dense<0.000000e+00> : vector<16xf32>
    %86 = vector.multi_reduction <add>, %85, %cst_39 [1] : vector<16x128xf32> to vector<16xf32>
    %87 = vector.shape_cast %86 : vector<16xf32> to vector<16x1xf32>
    %88 = tpu.reciprocal %87 {approx = true} : vector<16x1xf32> -> vector<16x1xf32>
    %89 = arith.mulf %87, %88 : vector<16x1xf32>
    %cst_40 = arith.constant 2.000000e+00 : f32
    %90 = vector.broadcast %cst_40 : f32 to vector<16x1xf32>
    %91 = arith.subf %90, %89 : vector<16x1xf32>
    %92 = arith.mulf %88, %91 : vector<16x1xf32>
    %cst_41 = arith.constant 0.000000e+00 : f32
    %93 = vector.shape_cast %92 : vector<16x1xf32> to vector<16x1xf32>
    %94 = vector.broadcast %93 : vector<16x1xf32> to vector<16x128xf32>
    %95 = vector.broadcast %cst_41 : f32 to vector<16x128xf32>
    %96 = arith.select %50, %94, %95 : vector<16x128xi1>, vector<16x128xf32>
    %97 = arith.addf %83, %96 : vector<16x128xf32>
    %98 = arith.mulf %68, %97 : vector<16x128xf32>
    %99 = arith.select %24, %26, %98 : vector<16x128xi1>, vector<16x128xf32>
    %c0_42 = arith.constant 0 : index
    %c0_43 = arith.constant 0 : index
    %100 = vector.load %arg9[%c0_42, %c0_43] : memref<16x128xf32, #tpu.memory_space<vmem>>, vector<16x128xf32>
    tpu.vector_store %arg9[%c0_42, %c0_43], %99 {strides = array<i32>} : memref<16x128xf32, #tpu.memory_space<vmem>>, vector<16x128xf32>,
    return
  }
  func.func @transform_0(%arg0: i32) -> (i32, i32) {
    %c0_i32 = arith.constant 0 : i32
    %c0_i32_0 = arith.constant 0 : i32
    return %arg0, %c0_i32 : i32, i32
  }
  func.func @transform_1(%arg0: i32) -> (i32, i32) {
    %c0_i32 = arith.constant 0 : i32
    %c0_i32_0 = arith.constant 0 : i32
    %c0_i32_1 = arith.constant 0 : i32
    return %c0_i32, %c0_i32_0 : i32, i32
  }
  func.func @transform_2(%arg0: i32) -> (i32, i32) {
    %c0_i32 = arith.constant 0 : i32
    %c0_i32_0 = arith.constant 0 : i32
    %c0_i32_1 = arith.constant 0 : i32
    return %c0_i32, %c0_i32_0 : i32, i32
  }
  func.func @transform_3(%arg0: i32) -> (i32, i32) {
    %c0_i32 = arith.constant 0 : i32
    %c0_i32_0 = arith.constant 0 : i32
    %c0_i32_1 = arith.constant 0 : i32
    return %c0_i32, %c0_i32_0 : i32, i32
  }
  func.func @transform_4(%arg0: i32) -> (i32, i32) {
    %c0_i32 = arith.constant 0 : i32
    %c0_i32_0 = arith.constant 0 : i32
    %c0_i32_1 = arith.constant 0 : i32
    return %c0_i32, %c0_i32_0 : i32, i32
  }
  func.func @transform_5(%arg0: i32) -> (i32, i32) {
    %c0_i32 = arith.constant 0 : i32
    %c0_i32_0 = arith.constant 0 : i32
    %c0_i32_1 = arith.constant 0 : i32
    return %c0_i32, %c0_i32_0 : i32, i32
  }
  func.func @transform_6(%arg0: i32) -> (i32, i32) {
    %c0_i32 = arith.constant 0 : i32
    %c0_i32_0 = arith.constant 0 : i32
    %c0_i32_1 = arith.constant 0 : i32
    return %c0_i32, %c0_i32_0 : i32, i32
  }
  func.func @transform_7(%arg0: i32) -> (i32, i32) {
    %c0_i32 = arith.constant 0 : i32
    %c0_i32_0 = arith.constant 0 : i32
    return %arg0, %c0_i32 : i32, i32
  }
  func.func @transform_8(%arg0: i32) -> (i32, i32) {
    %c0_i32 = arith.constant 0 : i32
    %c0_i32_0 = arith.constant 0 : i32
    return %arg0, %c0_i32 : i32, i32
  }
}

</mosaic_0001>

<bundles_post_ra>
// kernel: tpu_custom_call.1
= control target key start
LH: loop header
LB: loop body
LE: loop exit
PB: predicated region body
PF: predicated region fallthrough
CT: control target
= control target key end

     0   :  { %13 = vsyncpa [#allocation3], 0  ;;  %s1688_s0 = inlined_call_operand.vmem [shape: bf16[64,32], index: 0, kind: input, shape index: {}]   ;;  %s1689_s1 = inlined_call_operand.hbm [shape: bf16[32,128], index: 1, kind: input, shape index: {}]   ;;  %s1690_s2 = inlined_call_operand.vmem [shape: f32[1,128], index: 2, kind: input, shape index: {}]   ;;  %s1691_s3 = inlined_call_operand.hbm [shape: bf16[128,128], index: 3, kind: input, shape index: {}]   ;;  %s1692_s4 = inlined_call_operand.vmem [shape: f32[1,128], index: 4, kind: input, shape index: {}]   ;;  %s1693_s5 = inlined_call_operand.vmem [shape: bf16[128,128], index: 5, kind: input, shape index: {}]   ;;  %s1694_s6 = inlined_call_operand.vmem [shape: f32[1,128], index: 6, kind: input, shape index: {}]   ;;  %s1695_s7 = inlined_call_operand.hbm [shape: f32[64,128], index: 7, kind: input, shape index: {}]   ;;  %s1696_s8 = inlined_call_operand.hbm [shape: f32[64,128], index: 8, kind: output, shape index: {}]  }
   0x1   :  { %14 = vsyncpa [#allocation6], 0 }
   0x2   :  { %15 = vsyncpa [#allocation4], 0 }
   0x3   :  { %17 = vsyncpa [#allocation4 + $0x1], 0  ;;  %s1326_s27 = smov 0   ;;  %s1328_s28 = smov 0  }
   0x4   :  { %s1330_s29 = smov 0   ;;  %s1332_s30 = smov 0  }
   0x5 LB: > { %s1347_s9 = sadd.s32 4294967295, %s1267_s30   ;;  %s887_s10 = sadd.s32 4294967294, %s1267_s30   ;;  %s1267_s30 = sphi %s1332_s30, %s1731_s30   ;;  %s1263_s29 = sphi %s1330_s29, %s1735_s29   ;;  %s1259_s28 = sphi %s1328_s28, %s1734_s28   ;;  %s1255_s27 = sphi %s1326_s27, %s1733_s27  }
   0x6   : > { %s1351_s11 = sadd.s32 1, %s1267_s30   ;;  %s182_s12 = sadd.s32 1, %s1263_s29 }
   0x7   : > { %1705 = sst [smem:[#allocation13_spill]] %s1351_s11  ;;  %s179_s13 = ssub.s32 %s1267_s30, %s1351_s11 }
   0x8   : > { %p189_p0 = scmp.ne.s32.totalorder %s1263_s29, %s1259_s28  ;;  %p180_p1 = scmp.eq.s32.totalorder %s179_s13, 0 }
   0x9   : > { %p190_p2 = scmp.eq.s32.totalorder %s1267_s30, 0  ;;  %p195_p3 = scmp.ne.s32.totalorder %s1259_s28, %s1255_s27 }
   0xa   : > { %p1697_p4 = scmp.eq.s32.totalorder %s1347_s9, 0  ;;  %p219_p7 = scmp.eq.s32.totalorder %s1347_s9, 3 }
   0xb   : > { %s1363_s14 = scalar_select %p180_p1, %s1263_s29, %s182_s12  }
   0xc   : > { %p1365_p5 = por %p190_p2, %p189_p0  ;;  %p1371_p6 = por %p1697_p4, %p195_p3 }
   0xd   : > { %1706 = sst [smem:[#allocation14_spill]] %s1363_s14  ;;  %p225_p8 = scmp.eq.s32.totalorder %s887_s10, 3 }
   0xe   : > { %s1707_s15 = scalar_select %p1365_p5, 1, 0 }
   0xf   : > { %s1708_s16 = scalar_select %p1371_p6, 1, 0 }
  0x10   : > { %p888_p9 = scmp.ge.s32.totalorder %s1267_s30, 1  ;;  %p232_p10 = scmp.lt.s32.totalorder %s1267_s30, 5 }
  0x11   : > { %p1378_p11 = por %p219_p7, %p189_p0  ;;  %p1382_p12 = por %p225_p8, %p195_p3 }
  0x12   : > { %p1386_p13 = pnand %p888_p9, %p232_p10  ;;  %s1269_s20 = smov [#allocation2]  }
  0x13   : > { %s1709_s17 = scalar_select %p1378_p11, 1, 0 }
  0x14   : > { %s1710_s18 = scalar_select %p1382_p12, 1, 0 }
  0x15   : > { %s1712_s19 = scalar_select %p1386_p13, 1, 0 }
  0x16   : > { %1711 = sst [smem:[#allocation15_spill]] %s1710_s18  ;;  %p1013_p1 = pneg %p1386_p13 }
  0x17   : > { %s244_s21 = sshll.u32 %s1269_s20, 4  ;;  %s1270_s23 = smov [#allocation5]   ;;  %s245_s21 = int_to_ptr.vmem [resolvable:$true] %s244_s21 }
  0x18   : > { %p1394_p2 = pnand %p1013_p1, %p1697_p4  ;;  %s260_s24 = sshll.u32 %s1270_s23, 4  ;;  %s261_s24 = int_to_ptr.vmem [resolvable:$true] %s260_s24 }
  0x19   : > { %s1107_s10 = scalar_lea.hbm %s1689_s1, 256 }
  0x1a   : > { %p1108_p3 = scmp.ne.s32.totalorder %s1689_s1, %s1107_s10  ;;  %p1109_p7 = pneg %p1394_p2 }
  0x1b   : > { %p1114_p10 = scmp.lt.u32.totalorder %s1107_s10, %s1689_s1 }
  0x1c   : > { %p1110_p8 = pnand %p1109_p7, %p1108_p3 }
  0x1e   : > { %p1111_p9 = pneg %p1110_p8 }
  0x20   : > { %p1116_p1 = pnand %p1114_p10, %p1111_p9 }
  0x22   : > { %1119 = shalt.err (!%p1116_p1)
}
  0x23   : > { %s1120_s23 = scalar_lea.vmem %s245_s21, 256  ;;  %p1128_p11 = scmp.lt.s32.totalorder %s245_s21, %s245_s21 }
  0x24   : > { %p1121_p4 = scmp.ne.s32.totalorder %s245_s21, %s1120_s23  ;;  %p1129_p6 = scmp.lt.s32.totalorder %s1120_s23, %s1120_s23 }
  0x26   : > { %p1123_p0 = pnand %p1121_p4, %p1109_p7  ;;  %p1130_p13 = por %p1129_p6, %p1128_p11 }
  0x28   : > { %p1124_p12 = pneg %p1123_p0 }
  0x2a   : > { %p1131_p5 = pnand %p1130_p13, %p1124_p12 }
  0x2c   : > { %1134 = shalt.err (!%p1131_p5)
}
  0x2d   : > { %s1271_s25 = smov 64   ;;  %s1272_s14 = smov 4  }
  0x2e   : > { %1016 = dma.hbm_to_vmem [thread:$0]  (!%p1394_p2), %s1689_s1, 256, %s245_s21, [#allocation3], %s1271_s25, %s1271_s25, %s1272_s14  }
  0x2f   : > { %p1714_p3 = scmp.ne.s32.totalorder %s1707_s15, 0  ;;  %p1715_p8 = scmp.lt.s32.totalorder %s1267_s30, 4 }
  0x30   : > { %s1135_s23 = scalar_lea.hbm %s1691_s3, 1024 }
  0x31   : > { %p1425_p4 = pnand %p1715_p8, %p1714_p3  ;;  %p1136_p5 = scmp.ne.s32.totalorder %s1691_s3, %s1135_s23 }
  0x32   : > { %p1142_p12 = scmp.lt.u32.totalorder %s1135_s23, %s1691_s3 }
  0x33   : > { %s1716_s12 = scalar_select %p1425_p4, 1, 0 }
  0x34   : > { %p1138_p6 = pnand %p1136_p5, %p1109_p7 }
  0x36   : > { %p1139_p11 = pneg %p1138_p6 }
  0x38   : > { %p1144_p13 = pnand %p1142_p12, %p1139_p11 }
  0x3a   : > { %1147 = shalt.err (!%p1144_p13)
}
  0x3b   : > { %s1148_s26 = scalar_lea.vmem %s261_s24, 1024  ;;  %p1156_p1 = scmp.lt.s32.totalorder %s261_s24, %s261_s24 }
  0x3c   : > { %p1149_p0 = scmp.ne.s32.totalorder %s261_s24, %s1148_s26  ;;  %p1157_p3 = scmp.lt.s32.totalorder %s1148_s26, %s1148_s26 }
  0x3e   : > { %p1151_p9 = pnand %p1149_p0, %p1109_p7  ;;  %p1158_p8 = por %p1157_p3, %p1156_p1 }
  0x40   : > { %p1152_p10 = pneg %p1151_p9 }
  0x42   : > { %p1159_p4 = pnand %p1158_p8, %p1152_p10 }
  0x44   : > { %1162 = shalt.err (!%p1159_p4)
}
  0x45   : > { %1019 = dma.hbm_to_vmem [thread:$0]  (!%p1394_p2), %s1691_s3, 1024, %s261_s24, [#allocation6], %s1271_s25, %s1271_s25, %s1272_s14  }
  0x46   : > { %s292_s10 = sand.u32 1, %s1267_s30   ;;  %s294_s13 = sand.u32 1, %s1263_s29  }
  0x47   : > { %s892_s20 = sshll.u32 %s294_s13, 4  ;;  %s930_s23 = sshll.u32 %s1267_s30, 8 }
  0x48   : > { %s1455_s26 = scalar_lea.hbm %s1695_s7, %s930_s23  ;;  %s296_s22 = scalar_lea.vmem [#allocation7], %s892_s20 }
  0x49   : > { %s303_s11 = sshll.u32 %s296_s22, 4  ;;  %s1459_s18 = scalar_lea.sflag [#allocation3], %s292_s10  ;;  %s1457_s11 = int_to_ptr.vmem [resolvable:$true] %s303_s11 }
  0x4a   : > { %s1163_s24 = scalar_lea.hbm %s1455_s26, 256  ;;  %p1717_p7 = scmp.ne.s32.totalorder %s1716_s12, 0 }
  0x4b   : > { %p1164_p2 = scmp.ne.s32.totalorder %s1455_s26, %s1163_s24  ;;  %s1168_s13 = scalar_lea.hbm %s1695_s7, 1024 }
  0x4c   : > { %p1165_p4 = pneg %p1717_p7  ;;  %p1169_p11 = scmp.lt.u32.totalorder %s1455_s26, %s1695_s7 }
  0x4d   : > { %p1170_p12 = scmp.lt.u32.totalorder %s1168_s13, %s1163_s24  ;;  %p1172_p0 = scmp.lt.u32.totalorder %s1163_s24, %s1455_s26 }
  0x4e   : > { %p1166_p5 = pnand %p1165_p4, %p1164_p2 }
  0x4f   : > { %p1171_p13 = por %p1170_p12, %p1169_p11 }
  0x50   : > { %p1167_p6 = pneg %p1166_p5 }
  0x51   : > { %p1173_p9 = por %p1172_p0, %p1171_p13 }
  0x53   : > { %p1174_p10 = pnand %p1173_p9, %p1167_p6 }
  0x55   : > { %1177 = shalt.err (!%p1174_p10)
}
  0x56   : > { %s1178_s10 = scalar_lea.vmem %s1457_s11, 256  ;;  %s1273_s20 = smov [#allocation7]  }
  0x57   : > { %p1179_p1 = scmp.ne.s32.totalorder %s1457_s11, %s1178_s10  ;;  %s1183_s15 = sshll.u32 %s1273_s20, 4  ;;  %s1184_s15 = int_to_ptr.vmem [resolvable:$false] %s1183_s15 }
  0x58   : > { %s1185_s22 = scalar_lea.vmem %s1184_s15, 512  ;;  %p1186_p2 = scmp.lt.s32.totalorder %s1457_s11, %s1184_s15 }
  0x59   : > { %p1181_p3 = pnand %p1179_p1, %p1165_p4  ;;  %p1187_p5 = scmp.lt.s32.totalorder %s1185_s22, %s1178_s10 }
  0x5b   : > { %p1182_p8 = pneg %p1181_p3  ;;  %p1188_p11 = por %p1187_p5, %p1186_p2 }
  0x5d   : > { %p1189_p12 = pnand %p1188_p11, %p1182_p8 }
  0x5f   : > { %1192 = shalt.err (!%p1189_p12)
}
  0x60   : > { %s1274_s24 = smov 128   ;;  %s1275_s25 = smov 8  }
  0x61   : > { %1023 = dma.hbm_to_vmem [thread:$0]  (!%p1717_p7), %s1455_s26, 256, %s1457_s11, %s1459_s18, %s1274_s24, %s1274_s24, %s1275_s25  }
  0x62   : > { %p1718_p4 = scmp.ne.s32.totalorder %s1712_s19, 0 }
  0x63   : > { %p1719_p6 = scmp.eq.s32.totalorder (!%p1718_p4), %s1347_s9, 0 }
  0x64   : > { %315 = sbr.rel (%p1718_p4) target bundleno = 1135 (0x46f), region = 52 }
  0x6b   : > { %1238 = dma.done.wait (%p1719_p6), [#allocation3], 256   ;;  %p1720_p13 = pmov %p1719_p6 }
  0x6c   : > { %p1721_p0 = pmov %p1719_p6 }
  0x6d   : > { %1240 = vsyncadd (%p1720_p13), [#allocation3], 4294967040 }
  0x6e   : > { %1242 = dma.done.wait (%p1721_p0), [#allocation6], 1024   ;;  %p1722_p9 = pmov %p1721_p0 }
  0x6f   : > { %s325_s12 = sand.u32 1, %s1347_s9   ;;  %s327_s26 = sand.u32 1, %s1259_s28  }
  0x70   : > { %1244 = vsyncadd (%p1722_p9), [#allocation6], 4294966272  ;;  %s1501_s19 = sshll.u32 %s327_s26, 4  ;;  %s326_s11 = scalar_lea.sflag [#allocation3], %s325_s12 }
  0x71   : > { %s329_s18 = scalar_lea.vmem [#allocation7], %s1501_s19  ;;  %p1723_p7 = scmp.ne.s32.totalorder %s1708_s16, 0 }
  0x73   : > { %1246 = dma.done.wait (%p1723_p7), %s326_s11, 256  }
  0x74   : > { %1248 = vsyncadd (%p1723_p7), %s326_s11, 4294967040  ;;  %s900_s14 = sshll.u32 %s1347_s9, 1  ;;  %v1276_v0 = vmov 0.0   ;;  %vm1277_vm0 = vmmov 0   ;;  %v1076_v1 = vld [vmem:[#allocation2] sm:$0xff]   ;;  %v1077_v2 = vld [vmem:[#allocation2 + $0x8] sm:$0xff]   ;;  %v681_v40 = vlaneseq }
  0x75   : > { %953 = vmatprep.subr.bf16.mxu0 %v1276_v0  ;;  %957 = vmatprep.mubr.msk.bf16.mxu0 %vm1277_vm0, %v1276_v0  ;;  %p368_p10 = scmp.lt.s32.totalorder %s900_s14, 7  ;;  %v1079_v3 = vld [vmem:[#allocation5] sm:$0xff]   ;;  %v1080_v5 = vld [vmem:[#allocation5 + $0x8] sm:$0xff]   ;;  %vm406_vm1 = vcmask 261120   ;;  %v1081_v6 = vld [vmem:[#allocation5 + $0x10] sm:$0xff]   ;;  %p1728_p3 = scmp.ne.s32.totalorder %s1709_s17, 0 }
  0x76   : > { %961 = vmatprep.subr.bf16.mxu1 %v1276_v0  ;;  %977 = vmatprep.mubr.msk.bf16.mxu1 %vm1277_vm0, %v1276_v0  ;;  %v1082_v7 = vld [vmem:[#allocation5 + $0x18] sm:$0xff]   ;;  %v1083_v8 = vld [vmem:[#allocation5 + $0x20] sm:$0xff]   ;;  %v1084_v9 = vld [vmem:[#allocation5 + $0x28] sm:$0xff]   ;;  %v1566_v41 = vand.u32 127, %v681_v40  ;;  %s1278_s20 = smov [#allocation8]  }
  0x77   : > { %s1737_s14 = smov (!%p368_p10, %s900_s14), 7  ;;  %954 = vmatpush3.bf16.msra.mxu0 %v1076_v1  ;;  %962 = vmatpush3.bf16.msra.mxu1 %v1079_v3  ;;  %v1085_v10 = vld [vmem:[#allocation5 + $0x30] sm:$0xff]   ;;  %v1086_v11 = vld [vmem:[#allocation5 + $0x38] sm:$0xff]   ;;  %v1089_v14 = vld [vmem:[%s1693_s5 + $0x10] sm:$0xff]   ;;  %s1197_s15 = sshll.u32 %s1278_s20, 4  ;;  %s1198_s15 = int_to_ptr.vmem [resolvable:$false] %s1197_s15 }
  0x78   : > { %s901_s13 = sshll.u32 %s1737_s14, 2  ;;  %955 = vmatprep.subr.bf16.mxu0 %v1276_v0  ;;  %963 = vmatprep.subr.bf16.mxu1 %v1276_v0  ;;  %v1087_v12 = vld [vmem:[%s1693_s5] sm:$0xff]   ;;  %v1088_v13 = vld [vmem:[%s1693_s5 + $0x8] sm:$0xff]   ;;  %v1090_v15 = vld [vmem:[%s1693_s5 + $0x18] sm:$0xff]   ;;  %vm705_vm2 = vcmp.ge.s32.totalorder %v1566_v41, 7  ;;  %vm706_vm3 = vcmp.lt.s32.totalorder %v1566_v41, 12 }
  0x79   : > { %s371_s21 = scalar_lea.vmem %s1688_s0, %s901_s13  ;;  %v1091_v16 = vld [vmem:[%s1693_s5 + $0x20] sm:$0xff]   ;;  %v1092_v17 = vld [vmem:[%s1693_s5 + $0x28] sm:$0xff]   ;;  %v1093_v28 = vld [vmem:[%s1693_s5 + $0x30] sm:$0xff]   ;;  %vm692_vm4 = vcmp.ge.s32.totalorder %v1566_v41, 4  ;;  %vm693_vm5 = vcmp.lt.s32.totalorder %v1566_v41, 7  ;;  %vm683_vm9 = vcmp.lt.s32.totalorder %v1566_v41, 4 }
  0x7a   : > { %v1078_v4 = vld [vmem:[%s371_s21] sm:$0xff]   ;;  %v1094_v29 = vld [vmem:[%s1693_s5 + $0x38] sm:$0xff]   ;;  %vm1586_vm6 = vmand %vm705_vm2, %vm706_vm3  ;;  %s366_s13 = scalar_lea.vmem [#allocation8], %s1501_s19  ;;  %s1199_s22 = scalar_lea.vmem %s1198_s15, 512 }
  0x7b   : > { %956 = vmatpush3.bf16.msra.mxu0 %v1077_v2  ;;  %964 = vmatpush3.bf16.msra.mxu1 %v1080_v5  ;;  %v902_v18 = vld [vmem:[%s1690_s2] ss:$0 sm:$0xff]  ;;  %v687_v48 = vld [vmem:[%s329_s18 + $0x8] sm:$0xff]  ;;  %vm1592_vm7 = vmand %vm692_vm4, %vm693_vm5  ;;  %s783_s16 = sshll.u32 %s366_s13, 4  ;;  %s1643_s16 = int_to_ptr.vmem [resolvable:$true] %s783_s16 }
  0x7c   : > { %981 = vmatprep.subr.bf16.mxu0 %v1276_v0  ;;  %965 = vmatprep.subr.bf16.mxu1 %v1276_v0  ;;  %v907_v30 = vld [vmem:[%s1692_s4] ss:$0 sm:$0xff]  ;;  %vm718_vm8 = vmand %vm692_vm4, %vm706_vm3  ;;  %s1193_s19 = scalar_lea.vmem %s1643_s16, 256  ;;  %p1200_p5 = scmp.lt.s32.totalorder %s1643_s16, %s1198_s15 }
  0x7d   : > { %v916_v42 = vld [vmem:[%s1694_s6] ss:$0 sm:$0xff]  ;;  %p1194_p1 = scmp.ne.s32.totalorder %s1643_s16, %s1193_s19  ;;  %p1201_p11 = scmp.lt.s32.totalorder %s1199_s22, %s1193_s19 }
  0x7e   : > { %958 = vmatmul.mubr.msk.bf16.vlgmr.msra.gmra.mrb[0].mxu0 %vm406_vm1, %v1078_v4  ;;  %v686_v44 = vld [vmem:[%s329_s18] sm:$0xff]  ;;  %s931_s18 = sshll.u32 %s1347_s9, 8  ;;  %s1647_s9 = scalar_lea.sflag [#allocation4], %s327_s26 }
  0x7f   : > { %997 = vmatprep.mubr.msk.bf16.mxu0 %vm1277_vm0, %v1276_v0  ;;  %966 = vmatpush3.bf16.msra.mxu1 %v1081_v6  ;;  %s1641_s10 = scalar_lea.hbm %s1696_s8, %s931_s18  ;;  %p1195_p8 = pnand %p1194_p1, %p1728_p3 }
  0x80   : > { %967 = vmatprep.subr.bf16.mxu1 %v1276_v0  ;;  %982 = vmatpush3.bf16.msra.mxu0 %v1087_v12  ;;  %p1202_p12 = por %p1201_p11, %p1200_p5 }
  0x81   : > { %983 = vmatprep.subr.bf16.mxu0 %v1276_v0  ;;  %p1196_p2 = pneg %p1195_p8 }
  0x83   : > { %968 = vmatpush3.bf16.msra.mxu1 %v1082_v7  ;;  %p1203_p4 = pnand %p1202_p12, %p1196_p2 }
  0x84   : > { %969 = vmatprep.subr.bf16.mxu1 %v1276_v0  ;;  %984 = vmatpush3.bf16.msra.mxu0 %v1088_v13 }
  0x85   : > { %985 = vmatprep.subr.bf16.mxu0 %v1276_v0 }
  0x87   : > { %970 = vmatpush3.bf16.msra.mxu1 %v1083_v8 }
  0x88   : > { %971 = vmatprep.subr.bf16.mxu1 %v1276_v0  ;;  %986 = vmatpush3.bf16.msra.mxu0 %v1089_v14 }
  0x89   : > { %987 = vmatprep.subr.bf16.mxu0 %v1276_v0 }
  0x8b   : > { %972 = vmatpush3.bf16.msra.mxu1 %v1084_v9 }
  0x8c   : > { %973 = vmatprep.subr.bf16.mxu1 %v1276_v0  ;;  %988 = vmatpush3.bf16.msra.mxu0 %v1090_v15 }
  0x8d   : > { %989 = vmatprep.subr.bf16.mxu0 %v1276_v0 }
  0x8f   : > { %974 = vmatpush3.bf16.msra.mxu1 %v1085_v10 }
  0x90   : > { %975 = vmatprep.subr.bf16.mxu1 %v1276_v0  ;;  %990 = vmatpush3.bf16.msra.mxu0 %v1091_v16 }
  0x91   : > { %991 = vmatprep.subr.bf16.mxu0 %v1276_v0 }
  0x93   : > { %976 = vmatpush3.bf16.msra.mxu1 %v1086_v11 }
  0x94   : > { %992 = vmatpush3.bf16.msra.mxu0 %v1092_v17 }
  0x95   : > { %993 = vmatprep.subr.bf16.mxu0 %v1276_v0 }
  0x98   : > { %994 = vmatpush3.bf16.msra.mxu0 %v1093_v28 }
  0x99   : > { %995 = vmatprep.subr.bf16.mxu0 %v1276_v0 }
  0x9c   : > { %996 = vmatpush3.bf16.msra.mxu0 %v1094_v29 }
 0x151   : > { %v444_v19 = vpop.f32.mrb[0].mxu0 }
 0x152   : > { %v445_v20 = vadd.f32 %v902_v18, %v444_v19  ;;  %v959_v21 = vpop.f32.mrb[1].mxu0 }
 0x153   : > { %v447_v22 = vpop.f32.mrb[2].mxu0 }
 0x154   : > { %v448_v23 = vadd.f32 %v902_v18, %v447_v22  ;;  %v960_v24 = vpop.f32.mrb[3].mxu0  ;;  %v451_v25 = vmax.f32 %v445_v20, 0.0 }
 0x156   : > { %v452_v26 = vmax.f32 %v448_v23, 0.0 }
 0x158   : > { %v453_v27 = vpack.c.bf16 %v452_v26, %v451_v25 }
 0x15a   : > { %978 = vmatmul.mubr.bf16.vlgmr.msra.gmra.mrb[0].mxu1 %v453_v27 }
 0x22d   : > { %v559_v31 = vpop.f32.mrb[0].mxu1 }
 0x22e   : > { %v560_v32 = vadd.f32 %v907_v30, %v559_v31  ;;  %v979_v33 = vpop.f32.mrb[1].mxu1 }
 0x22f   : > { %v562_v34 = vpop.f32.mrb[2].mxu1 }
 0x230   : > { %v563_v35 = vadd.f32 %v907_v30, %v562_v34  ;;  %v980_v36 = vpop.f32.mrb[3].mxu1  ;;  %v566_v37 = vmax.f32 %v560_v32, 0.0 }
 0x232   : > { %v567_v38 = vmax.f32 %v563_v35, 0.0 }
 0x234   : > { %v568_v39 = vpack.c.bf16 %v567_v38, %v566_v37 }
 0x236   : > { %998 = vmatmul.mubr.bf16.vlgmr.msra.gmra.mrb[4].mxu0 %v568_v39 }
 0x309   : > { %v674_v43 = vpop.f32.mrb[4].mxu0 }
 0x30a   : > { %v1575_v45 = vadd.f32 %v916_v42, %v674_v43  ;;  %v999_v46 = vpop.f32.mrb[5].mxu0 }
 0x30b   : > { %v677_v47 = vpop.f32.mrb[6].mxu0 }
 0x30c   : > { %v688_v49 = vadd.f32 %v686_v44, %v1575_v45  ;;  %v1582_v50 = vadd.f32 %v916_v42, %v677_v47  ;;  %v1000_v51 = vpop.f32.mrb[7].mxu0  ;;  %v684_v43 = vmax.f32 %v1575_v45, 0.0 }
 0x30e   : > { %v690_v54 = vmul.f32 5.0, %v688_v49  ;;  %v689_v55 = vadd.f32 %v687_v48, %v1582_v50  ;;  %v685_v51 = vmax.f32 %v1582_v50, 0.0 }
 0x310   : > { %v691_v56 = vmul.f32 5.0, %v689_v55  ;;  %v708_v57 = vsel %vm1586_vm6, %v690_v54, -inf  ;;  %v695_v58 = vsel %vm1592_vm7, %v690_v54, -inf }
 0x311   : > { %710 = vmax.xlane.f32.xlu1 %v708_v57  ;;  %697 = vmax.xlane.f32.xlu0 %v695_v58 }
 0x312   : > { %v709_v59 = vsel %vm1586_vm6, %v691_v56, -inf  ;;  %v696_v60 = vsel %vm1592_vm7, %v691_v56, -inf }
 0x315   : > { %712 = vmax.xlane.f32.xlu1 %v709_v59  ;;  %699 = vmax.xlane.f32.xlu0 %v696_v60 }
 0x39e   : > { %v711_v61 = vpop.xlane.xlu1 %710  ;;  %v698_v62 = vpop.xlane.xlu0 %697 }
 0x39f   : > { %v714_v63 = vsel %vm1586_vm6, %v711_v61, 0.0  ;;  %v701_v0 = vsel %vm1592_vm7, %v698_v62, 0.0 }
 0x3a0   : > { %v716_v1 = vadd.f32 %v714_v63, %v701_v0 }
 0x3a2   : > { %v719_v2 = vsub.f32 %v690_v54, %v716_v1  ;;  %v713_v3 = vpop.xlane.xlu1 %712  ;;  %v700_v4 = vpop.xlane.xlu0 %699 }
 0x3a3   : > { %v715_v5 = vsel %vm1586_vm6, %v713_v3, 0.0  ;;  %v702_v6 = vsel %vm1592_vm7, %v700_v4, 0.0 }
 0x3a4   : > { %v721_v7 = vsel %vm718_vm8, %v719_v2, -inf  ;;  %v717_v8 = vadd.f32 %v715_v5, %v702_v6 }
 0x3a5   : > { %v723_v9 = vmul.f32 1.442695, %v721_v7 }
 0x3a6   : > { %v720_v10 = vsub.f32 %v691_v56, %v717_v8 }
 0x3a7   : > { %1095 = vpow2.f32 %v723_v9 }
 0x3a8   : > { %v722_v11 = vsel %vm718_vm8, %v720_v10, -inf }
 0x3a9   : > { %v725_v12 = vmul.f32 1.442695, %v722_v11 }
 0x3ab   : > { %1097 = vpow2.f32 %v725_v12 }
 0x3b1   : > { %v1096_v13 = vpop.eup %1095 }
 0x3b2   : > { %v727_v14 = vsel %vm1592_vm7, %v1096_v13, 0.0  ;;  %v745_v16 = vsel %vm1586_vm6, %v1096_v13, 0.0 }
 0x3b3   : > { %729 = vadd.xlane.f32.xlu0 %v727_v14 }
 0x3b5   : > { %v1098_v15 = vpop.eup %1097 }
 0x3b6   : > { %v728_v17 = vsel %vm1592_vm7, %v1098_v15, 0.0  ;;  %v746_v18 = vsel %vm1586_vm6, %v1098_v15, 0.0 }
 0x3b7   : > { %747 = vadd.xlane.f32.xlu0 %v745_v16  ;;  %731 = vadd.xlane.f32.xlu1 %v728_v17 }
 0x3bb   : > { %749 = vadd.xlane.f32.xlu1 %v746_v18 }
 0x440   : > { %v730_v19 = vpop.xlane.xlu0 %729 }
 0x441   : > { %1099 = vrcp.f32 %v730_v19 }
 0x444   : > { %v732_v20 = vpop.xlane.xlu1 %731  ;;  %v748_v21 = vpop.xlane.xlu0 %747 }
 0x445   : > { %1101 = vrcp.f32 %v732_v20 }
 0x446   : > { %1103 = vrcp.f32 %v748_v21 }
 0x448   : > { %v750_v22 = vpop.xlane.xlu1 %749 }
 0x449   : > { %1105 = vrcp.f32 %v750_v22 }
 0x44b   : > { %v1100_v23 = vpop.eup %1099 }
 0x44c   : > { %v735_v24 = vmul.f32 %v1100_v23, %v730_v19 }
 0x44e   : > { %v737_v26 = vsub.f32 2.0, %v735_v24 }
 0x44f   : > { %v1102_v25 = vpop.eup %1101 }
 0x450   : > { %v1104_v27 = vpop.eup %1103  ;;  %v736_v28 = vmul.f32 %v1102_v25, %v732_v20  ;;  %v739_v32 = vmul.f32 %v1100_v23, %v737_v26 }
 0x451   : > { %v753_v29 = vmul.f32 %v1104_v27, %v748_v21 }
 0x452   : > { %v738_v30 = vsub.f32 2.0, %v736_v28  ;;  %v741_v38 = vsel %vm1592_vm7, %v739_v32, 0.0 }
 0x453   : > { %v1106_v31 = vpop.eup %1105  ;;  %v755_v33 = vsub.f32 2.0, %v753_v29 }
 0x454   : > { %v754_v34 = vmul.f32 %v1106_v31, %v750_v22  ;;  %v740_v36 = vmul.f32 %v1102_v25, %v738_v30 }
 0x455   : > { %v757_v35 = vmul.f32 %v1104_v27, %v755_v33 }
 0x456   : > { %v756_v37 = vsub.f32 2.0, %v754_v34  ;;  %v742_v44 = vsel %vm1592_vm7, %v740_v36, 0.0 }
 0x457   : > { %v759_v39 = vsel %vm1586_vm6, %v757_v35, 0.0 }
 0x458   : > { %v761_v40 = vadd.f32 %v759_v39, %v741_v38  ;;  %v758_v42 = vmul.f32 %v1106_v31, %v756_v37 }
 0x45a   : > { %v763_v46 = vmul.f32 %v1096_v13, %v761_v40  ;;  %v760_v47 = vsel %vm1586_vm6, %v758_v42, 0.0 }
 0x45b   : > { %v762_v48 = vadd.f32 %v760_v47, %v742_v44 }
 0x45c   : > { %v765_v49 = vsel %vm683_vm9, %v684_v43, %v763_v46 }
 0x45d   : > { %767 = vst [vmem:[%s366_s13] sm:$0xff] %v765_v49  ;;  %v764_v41 = vmul.f32 %v1098_v15, %v762_v48 }
 0x45f   : > { %v766_v45 = vsel %vm683_vm9, %v685_v51, %v764_v41 }
 0x460   : > { %768 = vst [vmem:[%s366_s13 + $0x8] sm:$0xff] %v766_v45 }
 0x461   : > { %1206 = shalt.err (!%p1203_p4)
}
 0x462   : > { %s1207_s26 = scalar_lea.hbm %s1641_s10, 256  ;;  %s1211_s12 = scalar_lea.hbm %s1696_s8, 1024 }
 0x463   : > { %p1208_p6 = scmp.ne.s32.totalorder %s1641_s10, %s1207_s26  ;;  %p1212_p9 = scmp.lt.u32.totalorder %s1641_s10, %s1696_s8 }
 0x464   : > { %p1213_p7 = scmp.lt.u32.totalorder %s1211_s12, %s1207_s26  ;;  %p1215_p1 = scmp.lt.u32.totalorder %s1207_s26, %s1641_s10 }
 0x465   : > { %p1209_p13 = pnand %p1208_p6, %p1728_p3 }
 0x466   : > { %p1214_p10 = por %p1213_p7, %p1212_p9 }
 0x467   : > { %p1210_p0 = pneg %p1209_p13 }
 0x468   : > { %p1216_p8 = por %p1215_p1, %p1214_p10 }
 0x46a   : > { %p1217_p2 = pnand %p1216_p8, %p1210_p0 }
 0x46c   : > { %1220 = shalt.err (!%p1217_p2)
}
 0x46d   : > { %s1279_s18 = smov 128   ;;  %s1280_s13 = smov 8  }
 0x46e   : > { %1011 = dma.vmem_to_hbm [thread:$0]  (%p1728_p3), %s1643_s16, 256, %s1641_s10, %s1647_s9, %s1279_s18, %s1279_s18, %s1280_s13  }
 0x46f PF: > { %s1729_s23 = sld [smem:[#allocation15_spill]]  ;;  %p1033_p5 = scmp.ge.s32.totalorder %s1267_s30, 2 }
 0x470   : > { %s798_s21 = sand.u32 1, %s1255_s27  }
 0x471   : > { %s799_s19 = scalar_lea.sflag [#allocation4], %s798_s21 }
 0x475   : > { %p1730_p11 = scmp.ne.s32.totalorder %s1729_s23, 0 }
 0x477   : > { %p1025_p12 = pnand %p1033_p5, %p1730_p11 }
 0x479   : > { %1250 = dma.done.wait (!%p1025_p12), %s799_s19, 256  }
 0x47a   : > { %1252 = vsyncadd (!%p1025_p12), %s799_s19, 4294967040  ;;  %s1731_s30 = sld [smem:[#allocation13_spill]]  ;;  %s1732_s20 = sld [smem:[#allocation14_spill]] }
 0x47b   : > { %s1733_s27 = smov %s1259_s28  ;;  %s1734_s28 = smov %s1263_s29 }
 0x480   : > { %p20_p4 = scmp.ge.s32.totalorder %s1731_s30, 6   ;;  %s1735_s29 = smov %s1732_s20 }
 0x482   :  { %22 = sbr.rel (!%p20_p4) target bundleno = 5 (0x5), region = 107 }
 0x489   :  { %804 = vsyncpa [#allocation3], 1 }
 0x48a   :  { %806 = vsyncpa [#allocation3 + $0x1], 1 }
 0x48b   :  { %807 = vsyncpa [#allocation6], 1 }
 0x48c   :  { %808 = vsyncpa [#allocation4], 1 }
 0x48d   :  { %810 = vsyncpa [#allocation4 + $0x1], 1 }

</bundles_post_ra>
